<compile_context>
chip_gen: v5e
topology: v5e:2x2
jax: 0.10.0
libtpu: 0.0.40
codegen_flags: <defaults>
</compile_context>

<pallas_src>
import jax
import jax.numpy as jnp
import numpy as np
from jax.experimental import pallas as pl
from jax.experimental.pallas import tpu as pltpu

ITA = 100.0
GAMA = 0.9998


# ----------------------------- hardware queries -----------------------------
def _tpu_info():
    try:
        return pltpu.get_tpu_info()
    except Exception:
        return None


def _vmem_capacity_bytes():
    info = _tpu_info()
    if info is not None:
        v = getattr(info, "vmem_capacity_bytes", None)
        if isinstance(v, int) and v > 0:
            return v
    return 64 << 20  # conservative fallback: v7x per-TensorCore VMEM


def _num_tensorcores():
    info = _tpu_info()
    if info is not None:
        for name in ("num_cores", "core_count", "tensorcores_per_chip",
                     "num_tensorcores"):
            v = getattr(info, name, None)
            if isinstance(v, int) and v > 0:
                return v
    # Only use the 2-way parallel split when 2 TCs are positively detected.
    return 1


# ------------------------------- kernel body --------------------------------
def _tensor_gradient(x, h_is0, w_is0):
    """L1 TensorGradient, matching the PyTorch zero-pad semantics exactly.

    grad[..., j, k] = |x[..., j, k-1] - x[..., j, k]| + |x[..., j-1, k] - x[..., j, k]|
    with out-of-range (index -1) neighbours treated as 0.
    x: (B, C, H, W).  h_is0 / w_is0: (1, 1, H, W) boolean masks for j == 0 / k == 0.
    """
    sh_h = jnp.where(h_is0, 0.0, pltpu.roll(x, shift=1, axis=2))  # sublane shift
    sh_w = jnp.where(w_is0, 0.0, pltpu.roll(x, shift=1, axis=3))  # lane shift
    return jnp.abs(sh_w - x) + jnp.abs(sh_h - x)


def _anneal_loss_kernel(pred_ref, gt_ref, out_ref, grad_g_ref, acc_ref):
    i = pl.program_id(1)
    n_steps = pl.num_programs(1)
    _, nc, H, W = pred_ref.shape

    # Boundary masks shared by grad(gt) and all nc per-slice gradients.
    h_is0 = jax.lax.broadcasted_iota(jnp.int32, (1, 1, H, W), 2) == 0
    w_is0 = jax.lax.broadcasted_iota(jnp.int32, (1, 1, H, W), 3) == 0

    @pl.when(i == 0)
    def _():
        # grad(gt) is invariant across the N axis: compute once and cache.
        g0 = gt_ref[...].astype(jnp.float32)
        grad_g_ref[...] = _tensor_gradient(g0, h_is0, w_is0)
        acc_ref[...] = jnp.zeros_like(acc_ref)

    g = gt_ref[...].astype(jnp.float32)       # (B, 1, H, W)
    grad_g = grad_g_ref[...]                  # (B, 1, H, W)

    # Inner loop over the nc prediction slices of the chunk: keeps the live
    # working set at one (B, 1, H, W) slice (+ a few temporaries) regardless of
    # how large the DMA chunk is, so nc is sized purely for HBM/pipeline
    # efficiency (no vreg spills / VMEM blow-up at large nc).
    @pl.loop(0, nc)
    def _(j):
        p = pred_ref[:, pl.ds(j, 1), :, :].astype(jnp.float32)   # (B, 1, H, W)
        grad_p = _tensor_gradient(p, h_is0, w_is0)
        # Merged term: one accumulator RMW, one final cross-lane reduce.
        term = jnp.abs(grad_p - grad_g) + (p - g) ** 2
        acc_ref[...] += jnp.sum(term, axis=(0, 1))

    @pl.when(i == n_steps - 1)
    def _():
        out_ref[...] = jnp.zeros_like(out_ref) + jnp.sum(acc_ref[...])


# --------------------------------- wrapper -----------------------------------
def _choose_chunk(B, N, H, W, itemsize, budget_bytes):
    """Largest divisor of N whose double-buffered preds chunk + resident
    gt / scratch / inner-loop intermediates fit the per-TC VMEM budget."""
    plane_f32 = B * H * W * 4
    fixed = 2 * B * H * W * itemsize      # resident gt block (x2 buffers, conservative)
    fixed += plane_f32                    # cached grad(gt) f32 scratch
    fixed += H * W * 4                    # merged (H, W) f32 accumulator
    fixed += 6 * plane_f32                # inner-loop live intermediates (f32 cast,
                                          # 2 rolls, grad_p, diffs, term)
    per_slice = 2 * B * H * W * itemsize  # one (B,1,H,W) pred slice, double-buffered
    best = 1
    for nc in range(1, N + 1):
        if N % nc == 0 and fixed + nc * per_slice <= budget_bytes:
            best = nc
    # TODO(synk): for very large H*W even nc=1 may not fit; add a halo-free B
    # grid axis (and, beyond that, H tiling with a 1-row halo) in that regime.
    return best


def anneal_loss(step, preds, gt, ita=ITA, gama=GAMA, chunk=None, n_par=None):
    B, N, H, W = preds.shape
    assert gt.shape == (B, 1, H, W)

    itemsize = jnp.dtype(preds.dtype).itemsize
    vmem_cap = _vmem_capacity_bytes()
    # Per-TC chunk-search budget: ~1/3 of reported VMEM, clamped to [8, 40] MiB.
    # Leaves headroom for compiler-internal scratch even if the reported
    # capacity is a per-chip number on a 2-TC part.
    budget = int(max(8 << 20, min(vmem_cap // 3, 40 << 20)))

    nc = chunk if chunk is not None else _choose_chunk(B, N, H, W, itemsize, budget)
    assert N % nc == 0, "chunk must divide N"
    num_chunks = N // nc

    # 2-way split on the leading "parallel" axis only when 2 TensorCores are
    # actually present (v7x megacore); on 1-TC chips it just duplicates the
    # init/finalize epilogue, so keep the preds stream strictly sequential.
    if n_par is None:
        n_par = 2 if (_num_tensorcores() >= 2
                      and num_chunks >= 2 and num_chunks % 2 == 0) else 1
    assert num_chunks % n_par == 0, "n_par must divide the number of chunks"
    n_steps = num_chunks // n_par

    # Scoped-VMEM limit matched to what this launch actually needs (+ slack),
    # never above the reported capacity; floor at 32 MiB so we never shrink
    # below the generation defaults.
    plane_f32 = B * H * W * 4
    needed = (2 * B * nc * H * W * itemsize   # double-buffered preds chunk
              + 2 * B * H * W * itemsize      # gt block
              + plane_f32 + H * W * 4         # grad(gt) scratch + accumulator
              + 6 * plane_f32                 # inner-loop live intermediates
              + (1 << 20))                    # outputs + misc
    vmem_limit = int(min(vmem_cap, max(needed + (8 << 20), 32 << 20)))

    out = pl.pallas_call(
        _anneal_loss_kernel,
        out_shape=jax.ShapeDtypeStruct((n_par, 1, 128), jnp.float32),
        grid_spec=pltpu.PrefetchScalarGridSpec(
            num_scalar_prefetch=0,
            grid=(n_par, n_steps),
            in_specs=[
                # nc prediction slices per step; core p handles chunks
                # [p*n_steps, (p+1)*n_steps).
                pl.BlockSpec((B, nc, H, W),
                             lambda p, i: (0, p * n_steps + i, 0, 0)),
                # gt block index never changes -> stays resident in VMEM.
                pl.BlockSpec((B, 1, H, W), lambda p, i: (0, 0, 0, 0)),
            ],
            out_specs=pl.BlockSpec((1, 1, 128), lambda p, i: (p, 0, 0)),
            scratch_shapes=[
                pltpu.VMEM((B, 1, H, W), jnp.float32),  # cached grad(gt)
                pltpu.VMEM((H, W), jnp.float32),        # merged partial sums
            ],
        ),
        compiler_params=pltpu.CompilerParams(
            dimension_semantics=("parallel", "arbitrary"),
            vmem_limit_bytes=vmem_limit,
        ),
    )(preds, gt)

    total = jnp.sum(out[:, 0, 0])
    n_elem = B * 1 * H * W  # per-slice element count used by the mean reductions
    loss = total / (n_elem * N)
    return ita * (gama ** step) * loss


# ---------------- pure-JAX reference (mirrors the PyTorch code) ----------------
def _ref_tensor_gradient(img):
    w, h = img.shape[-2], img.shape[-1]
    nb = img.ndim
    l = jnp.pad(img, [(0, 0)] * (nb - 1) + [(1, 0)])
    r = jnp.pad(img, [(0, 0)] * (nb - 1) + [(0, 1)])
    u = jnp.pad(img, [(0, 0)] * (nb - 2) + [(1, 0), (0, 0)])
    d = jnp.pad(img, [(0, 0)] * (nb - 2) + [(0, 1), (0, 0)])
    return jnp.abs((l - r)[..., 0:w, 0:h]) + jnp.abs((u - d)[..., 0:w, 0:h])


def _ref_anneal_loss(step, preds, gt, ita=ITA, gama=GAMA):
    N = preds.shape[1]
    loss = 0.0
    for i in range(N):
        p = preds[:, i : i + 1]
        l1 = jnp.mean(jnp.abs(_ref_tensor_gradient(p) - _ref_tensor_gradient(gt)))
        l2 = jnp.mean((p - gt) ** 2)
        loss = loss + l1 + l2
    loss = loss / N
    return ita * (gama ** step) * loss


if __name__ == "__main__":
    key = jax.random.PRNGKey(0)
    k1, k2, k3, k4 = jax.random.split(key, 4)
    step = 10

    # 1) Small shape consistent with the module (collapses to one grid step).
    B, N, H, W = 2, 4, 16, 16
    preds = jax.random.normal(k1, (B, N, H, W), dtype=jnp.float32)
    gt = jax.random.normal(k2, (B, 1, H, W), dtype=jnp.float32)
    out = jax.block_until_ready(anneal_loss(step, preds, gt))
    ref = jax.block_until_ready(_ref_anneal_loss(step, preds, gt))
    np.testing.assert_allclose(np.asarray(out), np.asarray(ref), rtol=1e-4, atol=1e-4)

    # 2) Multi-chunk + forced 2-way partials on a lane-dense multi-tile layout:
    #    exercises roll across tile boundaries, the accumulate-across-steps
    #    path, and the per-partial (n_par,1,128) output path.
    B2, N2, H2, W2 = 2, 8, 24, 256
    preds2 = jax.random.normal(k3, (B2, N2, H2, W2), dtype=jnp.float32)
    gt2 = jax.random.normal(k4, (B2, 1, H2, W2), dtype=jnp.float32)
    out2 = jax.block_until_ready(anneal_loss(step, preds2, gt2, chunk=2, n_par=2))
    ref2 = jax.block_until_ready(_ref_anneal_loss(step, preds2, gt2))
    np.testing.assert_allclose(np.asarray(out2), np.asarray(ref2), rtol=1e-4, atol=1e-4)

    # 3) bf16 inputs (no wrapper pre-cast): kernel casts to f32 internally,
    #    reference computed on the same f32-cast values.
    B3, N3, H3, W3 = 2, 4, 32, 256
    preds3 = jax.random.normal(k3, (B3, N3, H3, W3), dtype=jnp.float32).astype(jnp.bfloat16)
    gt3 = jax.random.normal(k4, (B3, 1, H3, W3), dtype=jnp.float32).astype(jnp.bfloat16)
    out3 = jax.block_until_ready(anneal_loss(step, preds3, gt3))
    ref3 = jax.block_until_ready(
        _ref_anneal_loss(step, preds3.astype(jnp.float32), gt3.astype(jnp.float32)))
    np.testing.assert_allclose(np.asarray(out3), np.asarray(ref3), rtol=1e-4, atol=1e-4)

    print("KERNEL_OK")
</pallas_src>

<mosaic_0001>
module attributes {stable_mosaic.version = 11 : i64} {
  func.func @_anneal_loss_kernel(%arg0: i32, %arg1: i32, %arg2: memref<2x4x16x16xf32, #tpu.memory_space<vmem>>, %arg3: memref<2x1x16x16xf32, #tpu.memory_space<vmem>>, %arg4: memref<1x1x128xf32, #tpu.memory_space<vmem>>, %arg5: memref<2x1x16x16xf32, #tpu.memory_space<vmem>>, %arg6: memref<16x16xf32, #tpu.memory_space<vmem>>) attributes {dimension_semantics = [#tpu.dimension_semantics<parallel>, #tpu.dimension_semantics<arbitrary>], iteration_bounds = array<i64: 1, 1>, scalar_prefetch = 0 : i64, scratch_operands = 2 : i64, tpu.core_type = #tpu.core_type<tc>, window_params = [{transform_indices = @transform_0, window_bounds = array<i64: 2, 4, 16, 16>}, {pipeline_mode = #tpu.pipeline_mode<synchronous>, transform_indices = @transform_1, window_bounds = array<i64: 2, 1, 16, 16>}, {transform_indices = @transform_2, window_bounds = array<i64: 1, 1, 128>}]} {
    %0 = tpu.iota {dimensions = array<i32: 2>} : vector<1x1x16x16xi32>
    %c0_i32 = arith.constant 0 : i32
    %1 = vector.broadcast %c0_i32 : i32 to vector<1x1x16x16xi32>
    %2 = arith.cmpi eq, %0, %1 : vector<1x1x16x16xi32>
    %3 = tpu.iota {dimensions = array<i32: 3>} : vector<1x1x16x16xi32>
    %c0_i32_0 = arith.constant 0 : i32
    %4 = vector.broadcast %c0_i32_0 : i32 to vector<1x1x16x16xi32>
    %5 = arith.cmpi eq, %3, %4 : vector<1x1x16x16xi32>
    %c0_i32_1 = arith.constant 0 : i32
    %6 = arith.cmpi eq, %arg1, %c0_i32_1 : i32
    %7 = arith.extui %6 : i1 to i32
    %c0_i32_2 = arith.constant 0 : i32
    %8 = arith.cmpi ne, %7, %c0_i32_2 : i32
    scf.if %8 {
      %c0_14 = arith.constant 0 : index
      %c0_15 = arith.constant 0 : index
      %c0_16 = arith.constant 0 : index
      %c0_17 = arith.constant 0 : index
      %15 = vector.load %arg3[%c0_14, %c0_15, %c0_16, %c0_17] : memref<2x1x16x16xf32, #tpu.memory_space<vmem>>, vector<2x1x16x16xf32>
      %c1_i32_18 = arith.constant 1 : i32
      %16 = tpu.dynamic_rotate %15 by %c1_i32_18 dim 2 : vector<2x1x16x16xf32>, i32 -> vector<2x1x16x16xf32>
      %cst = arith.constant 0.000000e+00 : f32
      %17 = vector.shape_cast %2 : vector<1x1x16x16xi1> to vector<1x1x16x16xi1>
      %18 = vector.broadcast %17 : vector<1x1x16x16xi1> to vector<2x1x16x16xi1>
      %19 = vector.broadcast %cst : f32 to vector<2x1x16x16xf32>
      %20 = arith.select %18, %19, %16 : vector<2x1x16x16xi1>, vector<2x1x16x16xf32>
      %c1_i32_19 = arith.constant 1 : i32
      %21 = tpu.dynamic_rotate %15 by %c1_i32_19 dim 3 : vector<2x1x16x16xf32>, i32 -> vector<2x1x16x16xf32>
      %cst_20 = arith.constant 0.000000e+00 : f32
      %22 = vector.shape_cast %5 : vector<1x1x16x16xi1> to vector<1x1x16x16xi1>
      %23 = vector.broadcast %22 : vector<1x1x16x16xi1> to vector<2x1x16x16xi1>
      %24 = vector.broadcast %cst_20 : f32 to vector<2x1x16x16xf32>
      %25 = arith.select %23, %24, %21 : vector<2x1x16x16xi1>, vector<2x1x16x16xf32>
      %26 = arith.subf %25, %15 : vector<2x1x16x16xf32>
      %27 = math.absf %26 : vector<2x1x16x16xf32>
      %28 = arith.subf %20, %15 : vector<2x1x16x16xf32>
      %29 = math.absf %28 : vector<2x1x16x16xf32>
      %30 = arith.addf %27, %29 : vector<2x1x16x16xf32>
      %c0_21 = arith.constant 0 : index
      %c0_22 = arith.constant 0 : index
      %c0_23 = arith.constant 0 : index
      %c0_24 = arith.constant 0 : index
      %31 = vector.load %arg5[%c0_21, %c0_22, %c0_23, %c0_24] : memref<2x1x16x16xf32, #tpu.memory_space<vmem>>, vector<2x1x16x16xf32>
      tpu.vector_store %arg5[%c0_21, %c0_22, %c0_23, %c0_24], %30 {strides = array<i32>} : memref<2x1x16x16xf32, #tpu.memory_space<vmem>>, vector<2x1x16x16xf32>,
      %cst_25 = arith.constant 0.000000e+00 : f32
      %32 = vector.broadcast %cst_25 : f32 to vector<16x16xf32>
      %c0_26 = arith.constant 0 : index
      %c0_27 = arith.constant 0 : index
      %33 = vector.load %arg6[%c0_26, %c0_27] : memref<16x16xf32, #tpu.memory_space<vmem>>, vector<16x16xf32>
      tpu.vector_store %arg6[%c0_26, %c0_27], %32 {strides = array<i32>} : memref<16x16xf32, #tpu.memory_space<vmem>>, vector<16x16xf32>,
    } else {
    }
    %c0 = arith.constant 0 : index
    %c0_3 = arith.constant 0 : index
    %c0_4 = arith.constant 0 : index
    %c0_5 = arith.constant 0 : index
    %9 = vector.load %arg3[%c0, %c0_3, %c0_4, %c0_5] : memref<2x1x16x16xf32, #tpu.memory_space<vmem>>, vector<2x1x16x16xf32>
    %c0_6 = arith.constant 0 : index
    %c0_7 = arith.constant 0 : index
    %c0_8 = arith.constant 0 : index
    %c0_9 = arith.constant 0 : index
    %10 = vector.load %arg5[%c0_6, %c0_7, %c0_8, %c0_9] : memref<2x1x16x16xf32, #tpu.memory_space<vmem>>, vector<2x1x16x16xf32>
    %c0_i32_10 = arith.constant 0 : i32
    %c4_i32 = arith.constant 4 : i32
    %11 = arith.addi %c0_i32_10, %c4_i32 : i32
    %c1_i32 = arith.constant 1 : i32
    scf.for %arg7 = %c0_i32_10 to %11 step %c1_i32  : i32 {
      %c1_i32_14 = arith.constant 1 : i32
      %15 = arith.muli %arg7, %c1_i32_14 : i32
      %c0_i32_15 = arith.constant 0 : i32
      %16 = arith.addi %c0_i32_15, %15 : i32
      %c0_16 = arith.constant 0 : index
      %17 = arith.index_cast %16 : i32 to index
      %c0_17 = arith.constant 0 : index
      %c0_18 = arith.constant 0 : index
      %18 = vector.load %arg2[%c0_16, %17, %c0_17, %c0_18] : memref<2x4x16x16xf32, #tpu.memory_space<vmem>>, vector<2x1x16x16xf32>
      %c1_i32_19 = arith.constant 1 : i32
      %19 = tpu.dynamic_rotate %18 by %c1_i32_19 dim 2 : vector<2x1x16x16xf32>, i32 -> vector<2x1x16x16xf32>
      %cst = arith.constant 0.000000e+00 : f32
      %20 = vector.shape_cast %2 : vector<1x1x16x16xi1> to vector<1x1x16x16xi1>
      %21 = vector.broadcast %20 : vector<1x1x16x16xi1> to vector<2x1x16x16xi1>
      %22 = vector.broadcast %cst : f32 to vector<2x1x16x16xf32>
      %23 = arith.select %21, %22, %19 : vector<2x1x16x16xi1>, vector<2x1x16x16xf32>
      %c1_i32_20 = arith.constant 1 : i32
      %24 = tpu.dynamic_rotate %18 by %c1_i32_20 dim 3 : vector<2x1x16x16xf32>, i32 -> vector<2x1x16x16xf32>
      %cst_21 = arith.constant 0.000000e+00 : f32
      %25 = vector.shape_cast %5 : vector<1x1x16x16xi1> to vector<1x1x16x16xi1>
      %26 = vector.broadcast %25 : vector<1x1x16x16xi1> to vector<2x1x16x16xi1>
      %27 = vector.broadcast %cst_21 : f32 to vector<2x1x16x16xf32>
      %28 = arith.select %26, %27, %24 : vector<2x1x16x16xi1>, vector<2x1x16x16xf32>
      %29 = arith.subf %28, %18 : vector<2x1x16x16xf32>
      %30 = math.absf %29 : vector<2x1x16x16xf32>
      %31 = arith.subf %23, %18 : vector<2x1x16x16xf32>
      %32 = math.absf %31 : vector<2x1x16x16xf32>
      %33 = arith.addf %30, %32 : vector<2x1x16x16xf32>
      %34 = arith.subf %33, %10 : vector<2x1x16x16xf32>
      %35 = math.absf %34 : vector<2x1x16x16xf32>
      %36 = arith.subf %18, %9 : vector<2x1x16x16xf32>
      %37 = arith.mulf %36, %36 : vector<2x1x16x16xf32>
      %38 = arith.addf %35, %37 : vector<2x1x16x16xf32>
      %c0_22 = arith.constant 0 : index
      %c0_23 = arith.constant 0 : index
      %39 = vector.load %arg6[%c0_22, %c0_23] : memref<16x16xf32, #tpu.memory_space<vmem>>, vector<16x16xf32>
      %cst_24 = arith.constant dense<0.000000e+00> : vector<16x16xf32>
      %40 = vector.multi_reduction <add>, %38, %cst_24 [0, 1] : vector<2x1x16x16xf32> to vector<16x16xf32>
      %41 = arith.addf %39, %40 : vector<16x16xf32>
      %c0_25 = arith.constant 0 : index
      %c0_26 = arith.constant 0 : index
      %42 = vector.load %arg6[%c0_25, %c0_26] : memref<16x16xf32, #tpu.memory_space<vmem>>, vector<16x16xf32>
      tpu.vector_store %arg6[%c0_25, %c0_26], %41 {strides = array<i32>} : memref<16x16xf32, #tpu.memory_space<vmem>>, vector<16x16xf32>,
    }
    %c4_i32_11 = arith.constant 4 : i32
    %c0_i32_12 = arith.constant 0 : i32
    %12 = arith.cmpi eq, %arg1, %c0_i32_12 : i32
    %13 = arith.extui %12 : i1 to i32
    %c0_i32_13 = arith.constant 0 : i32
    %14 = arith.cmpi ne, %13, %c0_i32_13 : i32
    scf.if %14 {
      %cst = arith.constant 0.000000e+00 : f32
      %15 = vector.broadcast %cst : f32 to vector<1x1x128xf32>
      %c0_14 = arith.constant 0 : index
      %c0_15 = arith.constant 0 : index
      %16 = vector.load %arg6[%c0_14, %c0_15] : memref<16x16xf32, #tpu.memory_space<vmem>>, vector<16x16xf32>
      %17 = vector.shape_cast %16 : vector<16x16xf32> to vector<1x16x16xf32>
      %cst_16 = arith.constant dense<0.000000e+00> : vector<1xf32>
      %18 = vector.multi_reduction <add>, %17, %cst_16 [1, 2] : vector<1x16x16xf32> to vector<1xf32>
      %19 = vector.shape_cast %18 : vector<1xf32> to vector<1x1x1xf32>
      %20 = vector.extract %19[0, 0, 0] : f32 from vector<1x1x1xf32>
      %21 = vector.broadcast %20 : f32 to vector<1x1x128xf32>
      %22 = arith.addf %15, %21 : vector<1x1x128xf32>
      %c0_17 = arith.constant 0 : index
      %c0_18 = arith.constant 0 : index
      %c0_19 = arith.constant 0 : index
      %23 = vector.load %arg4[%c0_17, %c0_18, %c0_19] : memref<1x1x128xf32, #tpu.memory_space<vmem>>, vector<1x1x128xf32>
      tpu.vector_store %arg4[%c0_17, %c0_18, %c0_19], %22 {strides = array<i32>} : memref<1x1x128xf32, #tpu.memory_space<vmem>>, vector<1x1x128xf32>,
    } else {
    }
    return
  }
  func.func @transform_0(%arg0: i32, %arg1: i32) -> (i32, i32, i32, i32) {
    %c1_i32 = arith.constant 1 : i32
    %0 = arith.muli %arg0, %c1_i32 : i32
    %1 = arith.addi %0, %arg1 : i32
    %c0_i32 = arith.constant 0 : i32
    %c0_i32_0 = arith.constant 0 : i32
    %c0_i32_1 = arith.constant 0 : i32
    %c0_i32_2 = arith.constant 0 : i32
    return %c0_i32, %1, %c0_i32_0, %c0_i32_1 : i32, i32, i32, i32
  }
  func.func @transform_1(%arg0: i32, %arg1: i32) -> (i32, i32, i32, i32) {
    %c0_i32 = arith.constant 0 : i32
    %c0_i32_0 = arith.constant 0 : i32
    %c0_i32_1 = arith.constant 0 : i32
    %c0_i32_2 = arith.constant 0 : i32
    %c0_i32_3 = arith.constant 0 : i32
    return %c0_i32, %c0_i32_0, %c0_i32_1, %c0_i32_2 : i32, i32, i32, i32
  }
  func.func @transform_2(%arg0: i32, %arg1: i32) -> (i32, i32, i32) {
    %c0_i32 = arith.constant 0 : i32
    %c0_i32_0 = arith.constant 0 : i32
    %c0_i32_1 = arith.constant 0 : i32
    return %arg0, %c0_i32, %c0_i32_0 : i32, i32, i32
  }
}

</mosaic_0001>

<bundles_post_ra>
// kernel: tpu_custom_call.1
= control target key start
LH: loop header
LB: loop body
LE: loop exit
PB: predicated region body
PF: predicated region fallthrough
CT: control target
= control target key end

     0   :  { %7 = vsyncpa [#allocation5], 0  ;;  %s634_s0 = inlined_call_operand.hbm [shape: f32[2,4,16,16], index: 0, kind: input, shape index: {}]   ;;  %s635_s1 = inlined_call_operand.hbm [shape: f32[2,1,16,16], index: 1, kind: input, shape index: {}]   ;;  %s636_s2 = inlined_call_operand.hbm [shape: f32[1,1,128], index: 2, kind: output, shape index: {}]  }
   0x1   :  { %8 = vsyncpa [#allocation8], 0 }
   0x2   :  { %9 = vsyncpa [#allocation6], 0  ;;  %s19_s11 = sshll.u32 %s634_s0, 4  ;;  %s448_s12 = smov [#allocation4]   ;;  %s20_s11 = int_to_ptr.hbm [resolvable:$true] %s19_s11 }
   0x3   :  { %s21_s13 = sshll.u32 %s448_s12, 4  ;;  %s32_s16 = sshll.u32 %s635_s1, 4  ;;  %s22_s13 = int_to_ptr.vmem [resolvable:$true] %s21_s13  ;;  %s33_s16 = int_to_ptr.hbm [resolvable:$true] %s32_s16 }
   0x4   :  { %s449_s17 = smov 128   ;;  %s450_s18 = smov 8  }
   0x5   :  { %27 = dma.hbm_to_vmem [thread:$0]  %s20_s11, 2048, %s22_s13, [#allocation5], %s449_s17, %s449_s17, %s450_s18  }
   0x6   :  { %s451_s19 = smov [#allocation7]  }
   0x7   :  { %s34_s20 = sshll.u32 %s451_s19, 4  ;;  %s35_s20 = int_to_ptr.vmem [resolvable:$true] %s34_s20 }
   0x8   :  { %40 = dma.hbm_to_vmem [thread:$0]  %s33_s16, 512, %s35_s20, [#allocation8], %s449_s17, %s449_s17, %s450_s18  }
   0x9   :  { %438 = dma.done.wait [#allocation5], 2048  }
   0xa   :  { %439 = vsyncadd [#allocation5], 4294965248 }
   0xb   :  { %440 = dma.done.wait [#allocation8], 512  }
   0xc   :  { %441 = vsyncadd [#allocation8], 4294966784  ;;  %v479_v0 = vld [vmem:[#allocation7] sm:$0xff]  ;;  %v481_v1 = vld [vmem:[#allocation7 + $0x10] sm:$0xff]  ;;  %s452_s0 = smov 16   ;;  %vm84_vm0 = vcmask 1047680   ;;  %v51_v21 = vlaneseq }
   0xd   :  { %91 = vrot.lane.b32.xlu1 %v481_v1, %s452_s0  ;;  %85 = vrot.lane.b32.xlu0 %v479_v0, %s452_s0  ;;  %v485_v2 = vld [vmem:[#allocation7 + $0x8] sm:$0xff]  ;;  %v487_v3 = vld [vmem:[#allocation7 + $0x18] sm:$0xff]  ;;  %s453_s1 = smov 113   ;;  %vm151_vm1 = vcmask 130048   ;;  %v454_v14 = vmov 0.0   ;;  %v67_v24 = vrot.slane %v479_v0, 7 }
   0xe   :  { %156 = vst.msk [vmem:[#allocation3] sm:$0xff] %vm151_vm1, %v454_v14  ;;  %v509_v22 = vshrl.u32 %v51_v21, 7  ;;  %v69_v23 = vrot.slane %v485_v2, 7  ;;  %v517_v26 = vand.u32 127, %v51_v21  ;;  %v68_v36 = vrot.slane %v481_v1, 7  ;;  %s560_s21 = smov 0  }
   0xf   :  { %157 = vst.msk [vmem:[#allocation3 + $0x8] sm:$0xff] %vm151_vm1, %v454_v14  ;;  %v70_v37 = vrot.slane %v487_v3, 7 }
  0x10   :  { %vm71_vm2 = vcmp.lt.s32.totalorder %v509_v22, 1  ;;  %vm54_vm3 = vcmp.eq.s32.totalorder %v509_v22, 0  ;;  %vm58_vm4 = vcmp.eq.s32.totalorder %v517_v26, 0 }
  0x11   :  { %v74_v25 = vsel %vm71_vm2, %v69_v23, %v67_v24  ;;  %v73_v38 = vsel %vm71_vm2, %v68_v36, %v70_v37  ;;  %v72_v39 = vsel %vm71_vm2, %v67_v24, %v69_v23  ;;  %v75_v54 = vsel %vm71_vm2, %v70_v37, %v68_v36 }
  0x12   :  { %v80_v27 = vsel %vm54_vm3, 0.0, %v74_v25  ;;  %v142_v40 = vsub.f32 %v73_v38, %v487_v3  ;;  %v140_v41 = vsub.f32 %v72_v39, %v485_v2  ;;  %v82_v55 = vsel %vm54_vm3, 0.0, %v75_v54 }
  0x13   :  { %v139_v28 = vsub.f32 %v80_v27, %v479_v0  ;;  %v141_v56 = vsub.f32 %v82_v55, %v481_v1 }
  0x14   :  { %v146_v46 = vand.u32 2147483647, %v142_v40  ;;  %v144_v49 = vand.u32 2147483647, %v140_v41 }
  0x15   :  { %94 = vrot.lane.b32.xlu1 %v487_v3, %s452_s0  ;;  %88 = vrot.lane.b32.xlu0 %v485_v2, %s452_s0  ;;  %v143_v32 = vand.u32 2147483647, %v139_v28  ;;  %v145_v61 = vand.u32 2147483647, %v141_v56 }
  0x7f   :  { %v92_v4 = vpop.permute.xlu1 %91  ;;  %v86_v5 = vpop.permute.xlu0 %85 }
  0x80   :  { %v93_v6 = vsel %vm84_vm0, %v92_v4, %v481_v1  ;;  %v87_v7 = vsel %vm84_vm0, %v86_v5, %v479_v0 }
  0x81   :  { %101 = vrot.lane.b32.xlu0 %v93_v6, %s452_s0  ;;  %97 = vrot.lane.b32.xlu2 %v87_v7, %s452_s0 }
  0x87   :  { %v95_v8 = vpop.permute.xlu1 %94  ;;  %v89_v9 = vpop.permute.xlu0 %88 }
  0x88   :  { %v96_v10 = vsel %vm84_vm0, %v95_v8, %v487_v3  ;;  %v90_v11 = vsel %vm84_vm0, %v89_v9, %v485_v2 }
  0x89   :  { %103 = vrot.lane.b32.xlu1 %v96_v10, %s452_s0  ;;  %99 = vrot.lane.b32.xlu2 %v90_v11, %s452_s0 }
  0xdb   :  { %v98_v12 = vpop.permute.xlu2 %97 }
  0xdc   :  { %v105_v13 = vsel %vm84_vm0, %v98_v12, %v479_v0 }
  0xdd   :  { %115 = vrot.lane.b32.xlu2 %v105_v13, %s453_s1 }
  0xe3   :  { %v100_v15 = vpop.permute.xlu2 %99 }
  0xe4   :  { %v106_v16 = vsel %vm84_vm0, %v100_v15, %v485_v2 }
  0xe5   :  { %117 = vrot.lane.b32.xlu0 %v106_v16, %s453_s1 }
  0xf3   :  { %v102_v17 = vpop.permute.xlu0 %101 }
  0xf4   :  { %v107_v18 = vsel %vm84_vm0, %v102_v17, %v481_v1 }
  0xf5   :  { %119 = vrot.lane.b32.xlu1 %v107_v18, %s453_s1 }
  0xfb   :  { %v104_v19 = vpop.permute.xlu1 %103 }
  0xfc   :  { %v108_v20 = vsel %vm84_vm0, %v104_v19, %v487_v3 }
  0xfd   :  { %121 = vrot.lane.b32.xlu2 %v108_v20, %s453_s1 }
 0x137   :  { %v116_v29 = vpop.permute.xlu2 %115 }
 0x138   :  { %v127_v30 = vsel %vm58_vm4, 0.0, %v116_v29 }
 0x139   :  { %v131_v31 = vsub.f32 %v127_v30, %v479_v0 }
 0x13b   :  { %v135_v33 = vand.u32 2147483647, %v131_v31 }
 0x13d   :  { %v147_v34 = vadd.f32 %v143_v32, %v135_v33 }
 0x13f   :  { %152 = vst.msk [vmem:[#allocation2] sm:$0xff] %vm151_vm1, %v147_v34 }
 0x146   :  { %v527_v35 = vld [vmem:[#allocation2] sm:$0xff] }
 0x157   :  { %v122_v42 = vpop.permute.xlu2 %121  ;;  %v118_v43 = vpop.permute.xlu0 %117 }
 0x158   :  { %v130_v44 = vsel %vm58_vm4, 0.0, %v122_v42  ;;  %v128_v45 = vsel %vm58_vm4, 0.0, %v118_v43 }
 0x159   :  { %v134_v47 = vsub.f32 %v130_v44, %v487_v3  ;;  %v132_v48 = vsub.f32 %v128_v45, %v485_v2 }
 0x15b   :  { %v138_v50 = vand.u32 2147483647, %v134_v47  ;;  %v136_v51 = vand.u32 2147483647, %v132_v48 }
 0x15d   :  { %v150_v52 = vadd.f32 %v146_v46, %v138_v50  ;;  %v148_v53 = vadd.f32 %v144_v49, %v136_v51 }
 0x15f   :  { %155 = vst.msk [vmem:[#allocation2 + $0x18] sm:$0xff] %vm151_vm1, %v150_v52 }
 0x160   :  { %153 = vst.msk [vmem:[#allocation2 + $0x8] sm:$0xff] %vm151_vm1, %v148_v53 }
 0x166   :  { %v550_v57 = vld [vmem:[#allocation2 + $0x18] sm:$0xff] }
 0x167   :  { %v120_v58 = vpop.permute.xlu1 %119  ;;  %v552_v59 = vld [vmem:[#allocation2 + $0x8] sm:$0xff] }
 0x168   :  { %v129_v60 = vsel %vm58_vm4, 0.0, %v120_v58 }
 0x169   :  { %v133_v62 = vsub.f32 %v129_v60, %v481_v1 }
 0x16b   :  { %v137_v63 = vand.u32 2147483647, %v133_v62 }
 0x16d   :  { %v149_v4 = vadd.f32 %v145_v61, %v137_v63 }
 0x16f   :  { %154 = vst.msk [vmem:[#allocation2 + $0x10] sm:$0xff] %vm151_vm1, %v149_v4 }
 0x176   :  { %v558_v5 = vld [vmem:[#allocation2 + $0x10] sm:$0xff] }
 0x177 LB: > { %s341_s22 = sshll.u32 %s446_s21, 4  ;;  %s455_s24 = smov 16   ;;  %s446_s21 = sphi %s560_s21, %s171_s21  }
 0x178   : > { %s173_s23 = scalar_lea.vmem [#allocation4], %s341_s22  ;;  %s456_s25 = smov 113  }
 0x179   : > { %v566_v6 = vld [vmem:[%s173_s23 + $0x40] sm:$0xff]  ;;  %v177_v8 = vld [vmem:[%s173_s23 + $0x48] sm:$0xff]  ;;  %s171_s21 = sadd.s32 1, %s446_s21  }
 0x17a   : > { %v568_v7 = vld [vmem:[%s173_s23] sm:$0xff]  ;;  %202 = vrot.lane.b32.xlu1 %v566_v6, %s455_s24  ;;  %v175_v9 = vld [vmem:[%s173_s23 + $0x8] sm:$0xff]  ;;  %v179_v28 = vrot.slane %v566_v6, 7  ;;  %v181_v29 = vrot.slane %v177_v8, 7  ;;  %v273_v49 = vsub.f32 %v177_v8, %v487_v3  ;;  %p168_p0 = scmp.ge.s32.totalorder %s171_s21, 4  }
 0x17b   : > { %196 = vrot.lane.b32.xlu0 %v568_v7, %s455_s24  ;;  %v180_v31 = vrot.slane %v175_v9, 7  ;;  %v178_v32 = vrot.slane %v568_v7, 7  ;;  %v271_v51 = vsub.f32 %v175_v9, %v485_v2  ;;  %s457_s26 = smov (%p168_p0), [#allocation9]   ;;  %s323_s30 = sshll.u32 (%p168_p0), %s636_s2, 4  ;;  %s324_s30 = int_to_ptr.hbm [resolvable:$true] %s323_s30 }
 0x17c   : > { %v184_v33 = vsel %vm71_vm2, %v179_v28, %v181_v29  ;;  %v277_v58 = vmul.f32 %v273_v49, %v273_v49  ;;  %v186_v61 = vsel %vm71_vm2, %v181_v29, %v179_v28  ;;  %v272_v29 = vsub.f32 %v566_v6, %v481_v1  ;;  %s321_s27 = sshll.u32 (%p168_p0), %s457_s26, 4  ;;  %s322_s27 = int_to_ptr.vmem [resolvable:$true] %s321_s27 }
 0x17d   : > { %v183_v34 = vsel %vm71_vm2, %v178_v32, %v180_v31  ;;  %v185_v36 = vsel %vm71_vm2, %v180_v31, %v178_v32  ;;  %v253_v37 = vsub.f32 %v184_v33, %v177_v8  ;;  %v275_v62 = vmul.f32 %v271_v51, %v271_v51 }
 0x17e   : > { %v251_v38 = vsub.f32 %v183_v34, %v175_v9  ;;  %v191_v41 = vsel %vm54_vm3, 0.0, %v185_v36  ;;  %v276_v34 = vmul.f32 %v272_v29, %v272_v29 }
 0x17f   : > { %v257_v44 = vand.u32 2147483647, %v253_v37  ;;  %v250_v53 = vsub.f32 %v191_v41, %v568_v7 }
 0x180   : > { %v255_v47 = vand.u32 2147483647, %v251_v38 }
 0x181   : > { %v254_v4 = vand.u32 2147483647, %v250_v53 }
 0x182   : > { %205 = vrot.lane.b32.xlu1 %v177_v8, %s455_s24 }
 0x183   : > { %199 = vrot.lane.b32.xlu0 %v175_v9, %s455_s24 }
 0x1ec   : > { %v203_v10 = vpop.permute.xlu1 %202 }
 0x1ed   : > { %v197_v11 = vpop.permute.xlu0 %196  ;;  %v204_v12 = vsel %vm84_vm0, %v203_v10, %v566_v6 }
 0x1ee   : > { %v198_v13 = vsel %vm84_vm0, %v197_v11, %v568_v7  ;;  %212 = vrot.lane.b32.xlu0 %v204_v12, %s455_s24  ;;  %v193_v11 = vsel %vm54_vm3, 0.0, %v186_v61 }
 0x1ef   : > { %208 = vrot.lane.b32.xlu2 %v198_v13, %s455_s24 }
 0x1f4   : > { %v206_v14 = vpop.permute.xlu1 %205 }
 0x1f5   : > { %v200_v15 = vpop.permute.xlu0 %199  ;;  %v207_v16 = vsel %vm84_vm0, %v206_v14, %v177_v8 }
 0x1f6   : > { %v201_v17 = vsel %vm84_vm0, %v200_v15, %v175_v9  ;;  %214 = vrot.lane.b32.xlu1 %v207_v16, %s455_s24  ;;  %v252_v16 = vsub.f32 %v193_v11, %v566_v6 }
 0x1f7   : > { %210 = vrot.lane.b32.xlu2 %v201_v17, %s455_s24  ;;  %v283_v17 = vld [vmem:[#allocation3 + $0x8] sm:$0xff] }
 0x249   : > { %v209_v18 = vpop.permute.xlu2 %208 }
 0x24a   : > { %v216_v19 = vsel %vm84_vm0, %v209_v18, %v568_v7 }
 0x24b   : > { %226 = vrot.lane.b32.xlu2 %v216_v19, %s456_s25 }
 0x251   : > { %v211_v20 = vpop.permute.xlu2 %210 }
 0x252   : > { %v217_v21 = vsel %vm84_vm0, %v211_v20, %v175_v9 }
 0x253   : > { %228 = vrot.lane.b32.xlu0 %v217_v21, %s456_s25 }
 0x260   : > { %v213_v23 = vpop.permute.xlu0 %212 }
 0x261   : > { %v218_v24 = vsel %vm84_vm0, %v213_v23, %v566_v6 }
 0x262   : > { %230 = vrot.lane.b32.xlu1 %v218_v24, %s456_s25 }
 0x268   : > { %v215_v25 = vpop.permute.xlu1 %214 }
 0x269   : > { %v219_v27 = vsel %vm84_vm0, %v215_v25, %v177_v8  ;;  %v270_v25 = vsub.f32 %v568_v7, %v479_v0 }
 0x26a   : > { %232 = vrot.lane.b32.xlu2 %v219_v27, %s456_s25  ;;  %v256_v27 = vand.u32 2147483647, %v252_v16 }
 0x26b   : > { %v274_v32 = vmul.f32 %v270_v25, %v270_v25 }
 0x2a5   : > { %v227_v30 = vpop.permute.xlu2 %226 }
 0x2a6   : > { %v238_v48 = vsel %vm58_vm4, 0.0, %v227_v30 }
 0x2a7   : > { %v242_v54 = vsub.f32 %v238_v48, %v568_v7 }
 0x2c4   : > { %v233_v39 = vpop.permute.xlu2 %232 }
 0x2c5   : > { %v229_v40 = vpop.permute.xlu0 %228  ;;  %v241_v42 = vsel %vm58_vm4, 0.0, %v233_v39 }
 0x2c6   : > { %v239_v43 = vsel %vm58_vm4, 0.0, %v229_v40  ;;  %v245_v45 = vsub.f32 %v241_v42, %v177_v8  ;;  %v246_v8 = vand.u32 2147483647, %v242_v54  ;;  %v282_v40 = vld [vmem:[#allocation3] sm:$0xff] }
 0x2c7   : > { %v243_v46 = vsub.f32 %v239_v43, %v175_v9 }
 0x2c8   : > { %v249_v50 = vand.u32 2147483647, %v245_v45  ;;  %v258_v14 = vadd.f32 %v254_v4, %v246_v8 }
 0x2c9   : > { %v247_v52 = vand.u32 2147483647, %v243_v46 }
 0x2ca   : > { %v261_v55 = vadd.f32 %v257_v44, %v249_v50  ;;  %v262_v24 = vsub.f32 %v258_v14, %v527_v35 }
 0x2cb   : > { %v259_v56 = vadd.f32 %v255_v47, %v247_v52 }
 0x2cc   : > { %v265_v60 = vsub.f32 %v261_v55, %v550_v57  ;;  %v266_v31 = vand.u32 2147483647, %v262_v24 }
 0x2cd   : > { %v263_v63 = vsub.f32 %v259_v56, %v552_v59 }
 0x2ce   : > { %v269_v10 = vand.u32 2147483647, %v265_v60  ;;  %v278_v37 = vadd.f32 %v274_v32, %v266_v31 }
 0x2cf   : > { %v267_v9 = vand.u32 2147483647, %v263_v63 }
 0x2d0   : > { %v281_v12 = vadd.f32 %v277_v58, %v269_v10  ;;  %v285_v7 = vsel %vm151_vm1, %v278_v37, 0.0 }
 0x2d1   : > { %v279_v13 = vadd.f32 %v275_v62, %v267_v9 }
 0x2d2   : > { %v289_v15 = vsel %vm151_vm1, %v281_v12, 0.0 }
 0x2d3   : > { %v288_v18 = vsel %vm151_vm1, %v279_v13, 0.0 }
 0x2d4   : > { %v290_v19 = vadd.f32 %v289_v15, %v288_v18  ;;  %v231_v20 = vpop.permute.xlu1 %230 }
 0x2d5   : > { %v240_v21 = vsel %vm58_vm4, 0.0, %v231_v20 }
 0x2d6   : > { %v292_v23 = vadd.f32 %v290_v19, %v283_v17  ;;  %v244_v28 = vsub.f32 %v240_v21, %v566_v6 }
 0x2d8   : > { %294 = vst.msk [vmem:[#allocation3 + $0x8] sm:$0xff] %vm151_vm1, %v292_v23  ;;  %v248_v30 = vand.u32 2147483647, %v244_v28 }
 0x2da   : > { %v260_v33 = vadd.f32 %v256_v27, %v248_v30 }
 0x2dc   : > { %v264_v36 = vsub.f32 %v260_v33, %v558_v5 }
 0x2de   : > { %v268_v38 = vand.u32 2147483647, %v264_v36 }
 0x2df   :  { %v299_v44 = vld [vmem:[#allocation3 + $0x8] sm:$0xff] (%p168_p0) }
 0x2e0   : > { %v280_v39 = vadd.f32 %v276_v34, %v268_v38  ;;  %v302_v46 = vsel (%p168_p0), %vm151_vm1, %v299_v44, 0.0 }
 0x2e2   : > { %v286_v41 = vsel %vm151_vm1, %v280_v39, 0.0 }
 0x2e3   : > { %v287_v42 = vadd.f32 %v286_v41, %v285_v7  ;;  %170 = sbr.rel (!%p168_p0) target bundleno = 375 (0x177), region = 53 }
 0x2e5   : > { %v291_v43 = vadd.f32 %v287_v42, %v282_v40 }
 0x2e7   : > { %293 = vst.msk [vmem:[#allocation3] sm:$0xff] %vm151_vm1, %v291_v43 }
 0x2ee   :  { %v298_v6 = vld [vmem:[#allocation3] sm:$0xff] }
 0x2ef   :  { %v301_v45 = vsel %vm151_vm1, %v298_v6, 0.0 }
 0x2f0   :  { %v303_v47 = vadd.f32 %v302_v46, %v301_v45 }
 0x2f2   :  { %304 = vadd.xlane.f32.xlu0 %v303_v47 }
 0x365   :  { %v305_v48 = vpop.xlane.xlu0 %304 }
 0x366   :  { %v306_v49 = vrot.slane %v305_v48, 4 }
 0x368   :  { %v307_v50 = vadd.f32 %v306_v49, %v305_v48 }
 0x36a   :  { %v308_v51 = vrot.slane %v307_v50, 2 }
 0x36c   :  { %v309_v52 = vadd.f32 %v308_v51, %v307_v50 }
 0x36e   :  { %v310_v53 = vrot.slane %v309_v52, 1 }
 0x370   :  { %v311_v54 = vadd.f32 %v310_v53, %v309_v52 }
 0x372   :  { %342 = vpush %v311_v54 }
 0x3a3   :  { %s343_s3 = spop %342 }
 0x3a4   :  { %v313_v0 = vstv %s343_s3 }
 0x3a5   :  { %315 = vst [vmem:[#allocation9] sm:$0x1] %v313_v0 }
 0x3a6   :  { %326 = dma.vmem_to_hbm [thread:$0]  %s322_s27, 16, %s324_s30, [#allocation6]  }
 0x3a7   :  { %442 = dma.done.wait [#allocation6], 16  }
 0x3a8   :  { %443 = vsyncadd [#allocation6], 4294967280 }
 0x3a9   :  { %331 = vsyncpa [#allocation5], 1 }
 0x3aa   :  { %332 = vsyncpa [#allocation8], 1 }
 0x3ab   :  { %333 = vsyncpa [#allocation6], 1 }

</bundles_post_ra>
